<compile_context>
chip_gen: v6e
topology: v6e:2x2x1
jax: 0.10.0
libtpu: 0.0.40
codegen_flags: <defaults>
</compile_context>

<pallas_src>
import jax
import jax.numpy as jnp
from jax import lax
from jax.experimental import pallas as pl
from jax.experimental.pallas import tpu as pltpu

HIDDEN = 32
NUM_DIRECTIONS = 1
DUAL_HIDDEN = HIDDEN * NUM_DIRECTIONS  # dual_hidden_size


# ---------------------------------------------------------------------------
# Fused forward kernel: two RNN recurrences + bilinear scoring, one invocation.
# ---------------------------------------------------------------------------
def dual_encoder_kernel(ctx_ref, rsp_ref, wx_ref, wh_ref, b_ref, m_ref, out_ref):
    # ctx_ref / rsp_ref : (T*B, E) time-major (rows [t*B : (t+1)*B] = step t)
    # wx : (E, H)   wh : (H, H)   b : (1, H)   M : (H, H)
    # out : (B, 1)
    B = out_ref.shape[0]
    H = wh_ref.shape[0]
    T = ctx_ref.shape[0] // B

    # Weights loaded / cast once (bf16 MXU operands, f32 accumulation).
    wx_bf = wx_ref[...].astype(jnp.bfloat16)
    wh_bf = wh_ref[...].astype(jnp.bfloat16)
    bias = b_ref[...]                                            # (1, H) f32

    # Hoisted input projections + bias: two MXU matmuls off the serial path.
    xwb_c = jnp.dot(ctx_ref[...].astype(jnp.bfloat16), wx_bf,
                    preferred_element_type=jnp.float32) + bias   # (T*B, H) f32
    xwb_r = jnp.dot(rsp_ref[...].astype(jnp.bfloat16), wx_bf,
                    preferred_element_type=jnp.float32) + bias   # (T*B, H) f32

    # Two independent recurrences, carries live in vregs. T is small & static,
    # so this Python loop is fully unrolled; the per-step slices are static and
    # independent of the carry (off the serial dot -> add -> tanh chain).
    h_c = jnp.zeros((B, H), jnp.float32)
    h_r = jnp.zeros((B, H), jnp.float32)
    for t in range(T):
        pre_c = xwb_c[t * B:(t + 1) * B, :]
        pre_r = xwb_r[t * B:(t + 1) * B, :]
        h_c = jnp.tanh(pre_c + jnp.dot(h_c.astype(jnp.bfloat16), wh_bf,
                                       preferred_element_type=jnp.float32))
        h_r = jnp.tanh(pre_r + jnp.dot(h_r.astype(jnp.bfloat16), wh_bf,
                                       preferred_element_type=jnp.float32))

    # Bilinear score: dots[b] = c_h[b] @ M @ r_h[b]
    cm = jnp.dot(h_c.astype(jnp.bfloat16), m_ref[...].astype(jnp.bfloat16),
                 preferred_element_type=jnp.float32)             # (B, H)
    dots = jnp.sum(cm * h_r, axis=-1, keepdims=True)             # (B, 1)
    out_ref[...] = jax.nn.sigmoid(dots)                          # (B, 1)


# ---------------------------------------------------------------------------
# DualEncoder.forward (single grid-less pallas_call)
# ---------------------------------------------------------------------------
def dual_encoder_forward(contexts, responses, params):
    T, B, E = contexts.shape

    # (T, B, E) -> (T*B, E) is a free contiguous view; no concat, no copy.
    ctx_flat = contexts.reshape(T * B, E)
    rsp_flat = responses.reshape(T * B, E)

    vmem_specs = [pl.BlockSpec(memory_space=pltpu.MemorySpace.VMEM)
                  for _ in range(6)]

    scores = pl.pallas_call(
        dual_encoder_kernel,
        out_shape=jax.ShapeDtypeStruct((B, 1), jnp.float32),
        in_specs=vmem_specs,
        out_specs=pl.BlockSpec(memory_space=pltpu.MemorySpace.VMEM),
    )(ctx_flat, rsp_flat, params["wx"], params["wh"], params["b"], params["M"])

    # torch.stack of per-example [1, 1] scores -> (B, 1, 1)
    return scores.reshape(B, 1, 1)


# ---------------------------------------------------------------------------
# Pure-JAX reference mirroring the kernel's numerics (bf16 MXU operands,
# f32 accumulation, f32 elementwise) for a tight correctness check.
# ---------------------------------------------------------------------------
def _reference_forward(contexts, responses, params):
    wx_bf = params["wx"].astype(jnp.bfloat16)
    wh_bf = params["wh"].astype(jnp.bfloat16)
    m_bf = params["M"].astype(jnp.bfloat16)

    def rnn_last(x):
        def step(h, x_t):
            pre = jnp.dot(x_t.astype(jnp.bfloat16), wx_bf,
                          preferred_element_type=jnp.float32) + params["b"]
            h_new = jnp.tanh(pre + jnp.dot(h.astype(jnp.bfloat16), wh_bf,
                                           preferred_element_type=jnp.float32))
            return h_new, None

        h0 = jnp.zeros((x.shape[1], params["wh"].shape[0]), jnp.float32)
        hT, _ = lax.scan(step, h0, x)
        return hT

    c_h = rnn_last(contexts)
    r_h = rnn_last(responses)
    cm = jnp.dot(c_h.astype(jnp.bfloat16), m_bf,
                 preferred_element_type=jnp.float32)
    dots = jnp.sum(cm * r_h, axis=-1)
    return jax.nn.sigmoid(dots).reshape(-1, 1, 1)


def init_params(key, input_size, hidden_size):
    k_wx, k_wh, k_b, k_m = jax.random.split(key, 4)
    D = hidden_size * NUM_DIRECTIONS
    return {
        "wx": 0.1 * jax.random.normal(k_wx, (input_size, hidden_size), jnp.float32),
        "wh": 0.1 * jax.random.normal(k_wh, (hidden_size, hidden_size), jnp.float32),
        "b": 0.1 * jax.random.normal(k_b, (1, hidden_size), jnp.float32),
        # init.normal(M): standard normal, shape (D, D)
        "M": jax.random.normal(k_m, (D, D), jnp.float32),
    }


if __name__ == "__main__":
    key = jax.random.PRNGKey(0)
    k_params, k_ctx, k_rsp = jax.random.split(key, 3)

    B, T, E = 2, 8, 32  # batch, seq length, input feature size
    params = init_params(k_params, E, HIDDEN)

    contexts = jax.random.normal(k_ctx, (T, B, E), jnp.float32)
    responses = jax.random.normal(k_rsp, (T, B, E), jnp.float32)

    y_preds = dual_encoder_forward(contexts, responses, params)
    y_preds = jax.block_until_ready(y_preds)

    assert y_preds.shape == (B, 1, 1)
    assert bool(jnp.all(jnp.isfinite(y_preds)))

    y_ref = _reference_forward(contexts, responses, params)
    assert bool(jnp.allclose(y_preds, y_ref, rtol=2e-3, atol=2e-3))

    print("KERNEL_OK")
</pallas_src>

<mosaic_0001>
module attributes {stable_mosaic.version = 11 : i64} {
  func.func @dual_encoder_kernel(%arg0: memref<16x32xf32, #tpu.memory_space<vmem>>, %arg1: memref<16x32xf32, #tpu.memory_space<vmem>>, %arg2: memref<32x32xf32, #tpu.memory_space<vmem>>, %arg3: memref<32x32xf32, #tpu.memory_space<vmem>>, %arg4: memref<1x32xf32, #tpu.memory_space<vmem>>, %arg5: memref<32x32xf32, #tpu.memory_space<vmem>>, %arg6: memref<2x1xf32, #tpu.memory_space<vmem>>) attributes {dimension_semantics = [], scalar_prefetch = 0 : i64, scratch_operands = 0 : i64, tpu.core_type = #tpu.core_type<tc>} {
    %c0 = arith.constant 0 : index
    %c0_0 = arith.constant 0 : index
    %0 = vector.load %arg2[%c0, %c0_0] : memref<32x32xf32, #tpu.memory_space<vmem>>, vector<32x32xf32>
    %1 = arith.truncf %0 : vector<32x32xf32> to vector<32x32xbf16>
    %c0_1 = arith.constant 0 : index
    %c0_2 = arith.constant 0 : index
    %2 = vector.load %arg3[%c0_1, %c0_2] : memref<32x32xf32, #tpu.memory_space<vmem>>, vector<32x32xf32>
    %3 = arith.truncf %2 : vector<32x32xf32> to vector<32x32xbf16>
    %c0_3 = arith.constant 0 : index
    %c0_4 = arith.constant 0 : index
    %4 = vector.load %arg4[%c0_3, %c0_4] : memref<1x32xf32, #tpu.memory_space<vmem>>, vector<1x32xf32>
    %c0_5 = arith.constant 0 : index
    %c0_6 = arith.constant 0 : index
    %5 = vector.load %arg0[%c0_5, %c0_6] : memref<16x32xf32, #tpu.memory_space<vmem>>, vector<16x32xf32>
    %6 = arith.truncf %5 : vector<16x32xf32> to vector<16x32xbf16>
    %cst = arith.constant dense<0.000000e+00> : vector<16x32xf32>
    %7 = tpu.matmul %6, %1, %cst {dimension_numbers = #tpu.dot_dimension_numbers<[1], [0], [0], [1], [0, 0, 1, 1], [], []>} : vector<16x32xbf16>, vector<32x32xbf16>, vector<16x32xf32> -> vector<16x32xf32>
    %8 = vector.broadcast %4 : vector<1x32xf32> to vector<16x32xf32>
    %9 = arith.addf %7, %8 : vector<16x32xf32>
    %c0_7 = arith.constant 0 : index
    %c0_8 = arith.constant 0 : index
    %10 = vector.load %arg1[%c0_7, %c0_8] : memref<16x32xf32, #tpu.memory_space<vmem>>, vector<16x32xf32>
    %11 = arith.truncf %10 : vector<16x32xf32> to vector<16x32xbf16>
    %cst_9 = arith.constant dense<0.000000e+00> : vector<16x32xf32>
    %12 = tpu.matmul %11, %1, %cst_9 {dimension_numbers = #tpu.dot_dimension_numbers<[1], [0], [0], [1], [0, 0, 1, 1], [], []>} : vector<16x32xbf16>, vector<32x32xbf16>, vector<16x32xf32> -> vector<16x32xf32>
    %13 = vector.broadcast %4 : vector<1x32xf32> to vector<16x32xf32>
    %14 = arith.addf %12, %13 : vector<16x32xf32>
    %cst_10 = arith.constant 0.000000e+00 : f32
    %15 = vector.broadcast %cst_10 : f32 to vector<2x32xf32>
    %cst_11 = arith.constant 0.000000e+00 : f32
    %16 = vector.broadcast %cst_11 : f32 to vector<2x32xf32>
    %17 = vector.extract_strided_slice %9 {offsets = [0, 0], sizes = [2, 32], strides = [1, 1]} : vector<16x32xf32> to vector<2x32xf32>
    %18 = vector.extract_strided_slice %14 {offsets = [0, 0], sizes = [2, 32], strides = [1, 1]} : vector<16x32xf32> to vector<2x32xf32>
    %19 = arith.truncf %15 : vector<2x32xf32> to vector<2x32xbf16>
    %cst_12 = arith.constant dense<0.000000e+00> : vector<2x32xf32>
    %20 = tpu.matmul %19, %3, %cst_12 {dimension_numbers = #tpu.dot_dimension_numbers<[1], [0], [0], [1], [0, 0, 1, 1], [], []>} : vector<2x32xbf16>, vector<32x32xbf16>, vector<2x32xf32> -> vector<2x32xf32>
    %21 = arith.addf %17, %20 : vector<2x32xf32>
    %22 = math.tanh %21 : vector<2x32xf32>
    %23 = arith.truncf %16 : vector<2x32xf32> to vector<2x32xbf16>
    %cst_13 = arith.constant dense<0.000000e+00> : vector<2x32xf32>
    %24 = tpu.matmul %23, %3, %cst_13 {dimension_numbers = #tpu.dot_dimension_numbers<[1], [0], [0], [1], [0, 0, 1, 1], [], []>} : vector<2x32xbf16>, vector<32x32xbf16>, vector<2x32xf32> -> vector<2x32xf32>
    %25 = arith.addf %18, %24 : vector<2x32xf32>
    %26 = math.tanh %25 : vector<2x32xf32>
    %27 = vector.extract_strided_slice %9 {offsets = [2, 0], sizes = [2, 32], strides = [1, 1]} : vector<16x32xf32> to vector<2x32xf32>
    %28 = vector.extract_strided_slice %14 {offsets = [2, 0], sizes = [2, 32], strides = [1, 1]} : vector<16x32xf32> to vector<2x32xf32>
    %29 = arith.truncf %22 : vector<2x32xf32> to vector<2x32xbf16>
    %cst_14 = arith.constant dense<0.000000e+00> : vector<2x32xf32>
    %30 = tpu.matmul %29, %3, %cst_14 {dimension_numbers = #tpu.dot_dimension_numbers<[1], [0], [0], [1], [0, 0, 1, 1], [], []>} : vector<2x32xbf16>, vector<32x32xbf16>, vector<2x32xf32> -> vector<2x32xf32>
    %31 = arith.addf %27, %30 : vector<2x32xf32>
    %32 = math.tanh %31 : vector<2x32xf32>
    %33 = arith.truncf %26 : vector<2x32xf32> to vector<2x32xbf16>
    %cst_15 = arith.constant dense<0.000000e+00> : vector<2x32xf32>
    %34 = tpu.matmul %33, %3, %cst_15 {dimension_numbers = #tpu.dot_dimension_numbers<[1], [0], [0], [1], [0, 0, 1, 1], [], []>} : vector<2x32xbf16>, vector<32x32xbf16>, vector<2x32xf32> -> vector<2x32xf32>
    %35 = arith.addf %28, %34 : vector<2x32xf32>
    %36 = math.tanh %35 : vector<2x32xf32>
    %37 = vector.extract_strided_slice %9 {offsets = [4, 0], sizes = [2, 32], strides = [1, 1]} : vector<16x32xf32> to vector<2x32xf32>
    %38 = vector.extract_strided_slice %14 {offsets = [4, 0], sizes = [2, 32], strides = [1, 1]} : vector<16x32xf32> to vector<2x32xf32>
    %39 = arith.truncf %32 : vector<2x32xf32> to vector<2x32xbf16>
    %cst_16 = arith.constant dense<0.000000e+00> : vector<2x32xf32>
    %40 = tpu.matmul %39, %3, %cst_16 {dimension_numbers = #tpu.dot_dimension_numbers<[1], [0], [0], [1], [0, 0, 1, 1], [], []>} : vector<2x32xbf16>, vector<32x32xbf16>, vector<2x32xf32> -> vector<2x32xf32>
    %41 = arith.addf %37, %40 : vector<2x32xf32>
    %42 = math.tanh %41 : vector<2x32xf32>
    %43 = arith.truncf %36 : vector<2x32xf32> to vector<2x32xbf16>
    %cst_17 = arith.constant dense<0.000000e+00> : vector<2x32xf32>
    %44 = tpu.matmul %43, %3, %cst_17 {dimension_numbers = #tpu.dot_dimension_numbers<[1], [0], [0], [1], [0, 0, 1, 1], [], []>} : vector<2x32xbf16>, vector<32x32xbf16>, vector<2x32xf32> -> vector<2x32xf32>
    %45 = arith.addf %38, %44 : vector<2x32xf32>
    %46 = math.tanh %45 : vector<2x32xf32>
    %47 = vector.extract_strided_slice %9 {offsets = [6, 0], sizes = [2, 32], strides = [1, 1]} : vector<16x32xf32> to vector<2x32xf32>
    %48 = vector.extract_strided_slice %14 {offsets = [6, 0], sizes = [2, 32], strides = [1, 1]} : vector<16x32xf32> to vector<2x32xf32>
    %49 = arith.truncf %42 : vector<2x32xf32> to vector<2x32xbf16>
    %cst_18 = arith.constant dense<0.000000e+00> : vector<2x32xf32>
    %50 = tpu.matmul %49, %3, %cst_18 {dimension_numbers = #tpu.dot_dimension_numbers<[1], [0], [0], [1], [0, 0, 1, 1], [], []>} : vector<2x32xbf16>, vector<32x32xbf16>, vector<2x32xf32> -> vector<2x32xf32>
    %51 = arith.addf %47, %50 : vector<2x32xf32>
    %52 = math.tanh %51 : vector<2x32xf32>
    %53 = arith.truncf %46 : vector<2x32xf32> to vector<2x32xbf16>
    %cst_19 = arith.constant dense<0.000000e+00> : vector<2x32xf32>
    %54 = tpu.matmul %53, %3, %cst_19 {dimension_numbers = #tpu.dot_dimension_numbers<[1], [0], [0], [1], [0, 0, 1, 1], [], []>} : vector<2x32xbf16>, vector<32x32xbf16>, vector<2x32xf32> -> vector<2x32xf32>
    %55 = arith.addf %48, %54 : vector<2x32xf32>
    %56 = math.tanh %55 : vector<2x32xf32>
    %57 = vector.extract_strided_slice %9 {offsets = [8, 0], sizes = [2, 32], strides = [1, 1]} : vector<16x32xf32> to vector<2x32xf32>
    %58 = vector.extract_strided_slice %14 {offsets = [8, 0], sizes = [2, 32], strides = [1, 1]} : vector<16x32xf32> to vector<2x32xf32>
    %59 = arith.truncf %52 : vector<2x32xf32> to vector<2x32xbf16>
    %cst_20 = arith.constant dense<0.000000e+00> : vector<2x32xf32>
    %60 = tpu.matmul %59, %3, %cst_20 {dimension_numbers = #tpu.dot_dimension_numbers<[1], [0], [0], [1], [0, 0, 1, 1], [], []>} : vector<2x32xbf16>, vector<32x32xbf16>, vector<2x32xf32> -> vector<2x32xf32>
    %61 = arith.addf %57, %60 : vector<2x32xf32>
    %62 = math.tanh %61 : vector<2x32xf32>
    %63 = arith.truncf %56 : vector<2x32xf32> to vector<2x32xbf16>
    %cst_21 = arith.constant dense<0.000000e+00> : vector<2x32xf32>
    %64 = tpu.matmul %63, %3, %cst_21 {dimension_numbers = #tpu.dot_dimension_numbers<[1], [0], [0], [1], [0, 0, 1, 1], [], []>} : vector<2x32xbf16>, vector<32x32xbf16>, vector<2x32xf32> -> vector<2x32xf32>
    %65 = arith.addf %58, %64 : vector<2x32xf32>
    %66 = math.tanh %65 : vector<2x32xf32>
    %67 = vector.extract_strided_slice %9 {offsets = [10, 0], sizes = [2, 32], strides = [1, 1]} : vector<16x32xf32> to vector<2x32xf32>
    %68 = vector.extract_strided_slice %14 {offsets = [10, 0], sizes = [2, 32], strides = [1, 1]} : vector<16x32xf32> to vector<2x32xf32>
    %69 = arith.truncf %62 : vector<2x32xf32> to vector<2x32xbf16>
    %cst_22 = arith.constant dense<0.000000e+00> : vector<2x32xf32>
    %70 = tpu.matmul %69, %3, %cst_22 {dimension_numbers = #tpu.dot_dimension_numbers<[1], [0], [0], [1], [0, 0, 1, 1], [], []>} : vector<2x32xbf16>, vector<32x32xbf16>, vector<2x32xf32> -> vector<2x32xf32>
    %71 = arith.addf %67, %70 : vector<2x32xf32>
    %72 = math.tanh %71 : vector<2x32xf32>
    %73 = arith.truncf %66 : vector<2x32xf32> to vector<2x32xbf16>
    %cst_23 = arith.constant dense<0.000000e+00> : vector<2x32xf32>
    %74 = tpu.matmul %73, %3, %cst_23 {dimension_numbers = #tpu.dot_dimension_numbers<[1], [0], [0], [1], [0, 0, 1, 1], [], []>} : vector<2x32xbf16>, vector<32x32xbf16>, vector<2x32xf32> -> vector<2x32xf32>
    %75 = arith.addf %68, %74 : vector<2x32xf32>
    %76 = math.tanh %75 : vector<2x32xf32>
    %77 = vector.extract_strided_slice %9 {offsets = [12, 0], sizes = [2, 32], strides = [1, 1]} : vector<16x32xf32> to vector<2x32xf32>
    %78 = vector.extract_strided_slice %14 {offsets = [12, 0], sizes = [2, 32], strides = [1, 1]} : vector<16x32xf32> to vector<2x32xf32>
    %79 = arith.truncf %72 : vector<2x32xf32> to vector<2x32xbf16>
    %cst_24 = arith.constant dense<0.000000e+00> : vector<2x32xf32>
    %80 = tpu.matmul %79, %3, %cst_24 {dimension_numbers = #tpu.dot_dimension_numbers<[1], [0], [0], [1], [0, 0, 1, 1], [], []>} : vector<2x32xbf16>, vector<32x32xbf16>, vector<2x32xf32> -> vector<2x32xf32>
    %81 = arith.addf %77, %80 : vector<2x32xf32>
    %82 = math.tanh %81 : vector<2x32xf32>
    %83 = arith.truncf %76 : vector<2x32xf32> to vector<2x32xbf16>
    %cst_25 = arith.constant dense<0.000000e+00> : vector<2x32xf32>
    %84 = tpu.matmul %83, %3, %cst_25 {dimension_numbers = #tpu.dot_dimension_numbers<[1], [0], [0], [1], [0, 0, 1, 1], [], []>} : vector<2x32xbf16>, vector<32x32xbf16>, vector<2x32xf32> -> vector<2x32xf32>
    %85 = arith.addf %78, %84 : vector<2x32xf32>
    %86 = math.tanh %85 : vector<2x32xf32>
    %87 = vector.extract_strided_slice %9 {offsets = [14, 0], sizes = [2, 32], strides = [1, 1]} : vector<16x32xf32> to vector<2x32xf32>
    %88 = vector.extract_strided_slice %14 {offsets = [14, 0], sizes = [2, 32], strides = [1, 1]} : vector<16x32xf32> to vector<2x32xf32>
    %89 = arith.truncf %82 : vector<2x32xf32> to vector<2x32xbf16>
    %cst_26 = arith.constant dense<0.000000e+00> : vector<2x32xf32>
    %90 = tpu.matmul %89, %3, %cst_26 {dimension_numbers = #tpu.dot_dimension_numbers<[1], [0], [0], [1], [0, 0, 1, 1], [], []>} : vector<2x32xbf16>, vector<32x32xbf16>, vector<2x32xf32> -> vector<2x32xf32>
    %91 = arith.addf %87, %90 : vector<2x32xf32>
    %92 = math.tanh %91 : vector<2x32xf32>
    %93 = arith.truncf %86 : vector<2x32xf32> to vector<2x32xbf16>
    %cst_27 = arith.constant dense<0.000000e+00> : vector<2x32xf32>
    %94 = tpu.matmul %93, %3, %cst_27 {dimension_numbers = #tpu.dot_dimension_numbers<[1], [0], [0], [1], [0, 0, 1, 1], [], []>} : vector<2x32xbf16>, vector<32x32xbf16>, vector<2x32xf32> -> vector<2x32xf32>
    %95 = arith.addf %88, %94 : vector<2x32xf32>
    %96 = math.tanh %95 : vector<2x32xf32>
    %97 = arith.truncf %92 : vector<2x32xf32> to vector<2x32xbf16>
    %c0_28 = arith.constant 0 : index
    %c0_29 = arith.constant 0 : index
    %98 = vector.load %arg5[%c0_28, %c0_29] : memref<32x32xf32, #tpu.memory_space<vmem>>, vector<32x32xf32>
    %99 = arith.truncf %98 : vector<32x32xf32> to vector<32x32xbf16>
    %cst_30 = arith.constant dense<0.000000e+00> : vector<2x32xf32>
    %100 = tpu.matmul %97, %99, %cst_30 {dimension_numbers = #tpu.dot_dimension_numbers<[1], [0], [0], [1], [0, 0, 1, 1], [], []>} : vector<2x32xbf16>, vector<32x32xbf16>, vector<2x32xf32> -> vector<2x32xf32>
    %101 = arith.mulf %100, %96 : vector<2x32xf32>
    %cst_31 = arith.constant dense<0.000000e+00> : vector<2xf32>
    %102 = vector.multi_reduction <add>, %101, %cst_31 [1] : vector<2x32xf32> to vector<2xf32>
    %103 = vector.shape_cast %102 : vector<2xf32> to vector<2x1xf32>
    %104 = arith.negf %103 : vector<2x1xf32>
    %105 = math.exp %104 : vector<2x1xf32>
    %cst_32 = arith.constant 1.000000e+00 : f32
    %106 = vector.broadcast %cst_32 : f32 to vector<2x1xf32>
    %107 = arith.addf %106, %105 : vector<2x1xf32>
    %108 = arith.divf %106, %107 : vector<2x1xf32>
    %c0_33 = arith.constant 0 : index
    %c0_34 = arith.constant 0 : index
    %109 = vector.load %arg6[%c0_33, %c0_34] : memref<2x1xf32, #tpu.memory_space<vmem>>, vector<2x1xf32>
    tpu.vector_store %arg6[%c0_33, %c0_34], %108 {strides = array<i32>} : memref<2x1xf32, #tpu.memory_space<vmem>>, vector<2x1xf32>,
    return
  }
}

</mosaic_0001>

<bundles_post_ra>
// kernel: tpu_custom_call.1
= control target key start
LH: loop header
LB: loop body
LE: loop exit
PB: predicated region body
PF: predicated region fallthrough
CT: control target
= control target key end

     0   :  { %11 = vsyncpa [#allocation3], 0  ;;  %s1625_s0 = inlined_call_operand.hbm [shape: f32[16,32], index: 0, kind: input, shape index: {}]   ;;  %s1626_s1 = inlined_call_operand.hbm [shape: f32[16,32], index: 1, kind: input, shape index: {}]   ;;  %s1627_s2 = inlined_call_operand.hbm [shape: f32[32,32], index: 2, kind: input, shape index: {}]   ;;  %s1628_s3 = inlined_call_operand.hbm [shape: f32[32,32], index: 3, kind: input, shape index: {}]   ;;  %s1629_s4 = inlined_call_operand.vmem [shape: f32[1,32], index: 4, kind: input, shape index: {}]   ;;  %s1630_s5 = inlined_call_operand.hbm [shape: f32[32,32], index: 5, kind: input, shape index: {}]   ;;  %s1631_s6 = inlined_call_operand.vmem [shape: f32[2,1], index: 6, kind: output, shape index: {}]  }
   0x1   :  { %12 = vsyncpa [#allocation5], 0 }
   0x2   :  { %13 = vsyncpa [#allocation8], 0  ;;  %s1397_s21 = smov [#allocation4]   ;;  %s1398_s23 = smov [#allocation7]  }
   0x3   :  { %s31_s22 = sshll.u32 %s1397_s21, 4  ;;  %s55_s24 = sshll.u32 %s1398_s23, 4  ;;  %s32_s22 = int_to_ptr.vmem [resolvable:$true] %s31_s22  ;;  %s56_s24 = int_to_ptr.vmem [resolvable:$true] %s55_s24 }
   0x4   :  { %s1299_s25 = scalar_lea.vmem %s32_s22, 256  ;;  %p1304_p1 = scmp.lt.s32.totalorder %s32_s22, %s32_s22 }
   0x5   :  { %p1300_p0 = scmp.ne.s32.totalorder %s32_s22, %s1299_s25  ;;  %p1305_p2 = scmp.lt.s32.totalorder %s1299_s25, %s1299_s25 }
   0x7   :  { %p1306_p3 = por %p1305_p2, %p1304_p1 }
   0x9   :  { %p1307_p4 = pnand %p1306_p3, %p1300_p0 }
   0xb   :  { %1310 = shalt.err (!%p1307_p4)
}
   0xc   :  { %s1399_s26 = smov 128   ;;  %s1400_s27 = smov 8  }
   0xd   :  { %37 = dma.hbm_to_vmem [thread:$0]  %s1626_s1, 256, %s32_s22, [#allocation5], %s1399_s26, %s1399_s26, %s1400_s27  }
   0xe   :  { %s1319_s30 = scalar_lea.vmem %s56_s24, 512  ;;  %p1324_p6 = scmp.lt.s32.totalorder %s56_s24, %s56_s24 }
   0xf   :  { %p1320_p5 = scmp.ne.s32.totalorder %s56_s24, %s1319_s30  ;;  %p1325_p7 = scmp.lt.s32.totalorder %s1319_s30, %s1319_s30 }
  0x11   :  { %p1326_p8 = por %p1325_p7, %p1324_p6 }
  0x13   :  { %p1327_p9 = pnand %p1326_p8, %p1320_p5 }
  0x15   :  { %1330 = shalt.err (!%p1327_p9)
}
  0x16   :  { %61 = dma.hbm_to_vmem [thread:$0]  %s1628_s3, 512, %s56_s24, [#allocation8], %s1399_s26, %s1399_s26, %s1400_s27  }
  0x17   :  { %s1401_s9 = smov [#allocation2]   ;;  %s1402_s11 = smov [#allocation6]  }
  0x18   :  { %s19_s10 = sshll.u32 %s1401_s9, 4  ;;  %s43_s12 = sshll.u32 %s1402_s11, 4  ;;  %s20_s10 = int_to_ptr.vmem [resolvable:$true] %s19_s10  ;;  %s44_s12 = int_to_ptr.vmem [resolvable:$true] %s43_s12 }
  0x19   :  { %s1339_s1 = scalar_lea.vmem %s20_s10, 256  ;;  %p1344_p11 = scmp.lt.s32.totalorder %s20_s10, %s20_s10 }
  0x1a   :  { %p1340_p10 = scmp.ne.s32.totalorder %s20_s10, %s1339_s1  ;;  %p1345_p12 = scmp.lt.s32.totalorder %s1339_s1, %s1339_s1 }
  0x1c   :  { %p1346_p13 = por %p1345_p12, %p1344_p11 }
  0x1e   :  { %p1347_p0 = pnand %p1346_p13, %p1340_p10 }
  0x20   :  { %1350 = shalt.err (!%p1347_p0)
}
  0x21   :  { %25 = dma.hbm_to_vmem [thread:$0]  %s1625_s0, 256, %s20_s10, [#allocation3], %s1399_s26, %s1399_s26, %s1400_s27  }
  0x22   :  { %s1359_s3 = scalar_lea.vmem %s44_s12, 512  ;;  %p1364_p2 = scmp.lt.s32.totalorder %s44_s12, %s44_s12 }
  0x23   :  { %p1360_p1 = scmp.ne.s32.totalorder %s44_s12, %s1359_s3  ;;  %p1365_p3 = scmp.lt.s32.totalorder %s1359_s3, %s1359_s3 }
  0x25   :  { %p1366_p4 = por %p1365_p3, %p1364_p2 }
  0x27   :  { %p1367_p5 = pnand %p1366_p4, %p1360_p1 }
  0x29   :  { %1370 = shalt.err (!%p1367_p5)
}
  0x2a   :  { %49 = dma.hbm_to_vmem [thread:$0]  %s1627_s2, 512, %s44_s12, [#allocation5], %s1399_s26, %s1399_s26, %s1400_s27  }
  0x2b   :  { %s1403_s17 = smov [#allocation9]  }
  0x2c   :  { %s69_s18 = sshll.u32 %s1403_s17, 4  ;;  %s70_s18 = int_to_ptr.vmem [resolvable:$true] %s69_s18 }
  0x2d   :  { %s1379_s19 = scalar_lea.vmem %s70_s18, 512  ;;  %p1384_p7 = scmp.lt.s32.totalorder %s70_s18, %s70_s18 }
  0x2e   :  { %p1380_p6 = scmp.ne.s32.totalorder %s70_s18, %s1379_s19  ;;  %p1385_p8 = scmp.lt.s32.totalorder %s1379_s19, %s1379_s19 }
  0x30   :  { %p1386_p9 = por %p1385_p8, %p1384_p7 }
  0x32   :  { %p1387_p10 = pnand %p1386_p9, %p1380_p6 }
  0x34   :  { %1390 = shalt.err (!%p1387_p10)
}
  0x35   :  { %75 = dma.hbm_to_vmem [thread:$0]  %s1630_s5, 512, %s70_s18, [#allocation8], %s1399_s26, %s1399_s26, %s1400_s27  }
  0x36   :  { %1391 = dma.done.wait [#allocation3], 256  }
  0x37   :  { %1392 = vsyncadd [#allocation3], 4294967040 }
  0x38   :  { %1393 = dma.done.wait [#allocation5], 768  }
  0x39   :  { %1394 = vsyncadd [#allocation5], 4294966528 }
  0x3a   :  { %1395 = dma.done.wait [#allocation8], 1024  }
  0x3b   :  { %1396 = vsyncadd [#allocation8], 4294966272  ;;  %v1404_v0 = vmov 0.0   ;;  %vm1405_vm0 = vmmov 0   ;;  %v94_v1 = vld [vmem:[#allocation6 + $0x10] sm:$0xff]  ;;  %v95_v2 = vld [vmem:[#allocation6 + $0x18] sm:$0xff] }
  0x3c   :  { %1101 = vmatprep.subr.bf16.mxu0 %v1404_v0  ;;  %1109 = vmatprep.subr.bf16.mxu1 %v1404_v0  ;;  %v92_v3 = vld [vmem:[#allocation6] sm:$0xff]  ;;  %v97_v4 = vpack.c.bf16 %v95_v2, %v94_v1  ;;  %v93_v5 = vld [vmem:[#allocation6 + $0x8] sm:$0xff]  ;;  %v159_v9 = vld [vmem:[#allocation4] sm:$0xff]  ;;  %vm114_vm1 = vcmask 261120   ;;  %v1406_v19 = vmov 0   ;;  %vm1009_vm2 = vcmask 254976  }
  0x3d   :  { %1105 = vmatprep.mubr.msk.bf16.mxu0 %vm1405_vm0, %v1404_v0  ;;  %1113 = vmatprep.mubr.msk.bf16.mxu1 %vm1405_vm0, %v1404_v0  ;;  %v105_v6 = vld [vmem:[#allocation2] sm:$0xff]  ;;  %v96_v7 = vpack.c.bf16 %v93_v5, %v92_v3  ;;  %v106_v8 = vld [vmem:[#allocation2 + $0x8] sm:$0xff]  ;;  %v160_v10 = vld [vmem:[#allocation4 + $0x8] sm:$0xff]  ;;  %vm1019_vm3 = vcmask 1024  }
  0x3e   :  { %1102 = vmatpush3.bf16.msra.mxu0 %v97_v4  ;;  %1110 = vmatpush3.bf16.msra.mxu1 %v97_v4  ;;  %v100_v11 = vld [vmem:[#allocation7 + $0x10] sm:$0xff]  ;;  %v101_v12 = vld [vmem:[#allocation7 + $0x18] sm:$0xff]  ;;  %v107_v13 = vpack.c.bf16 %v106_v8, %v105_v6  ;;  %v161_v14 = vpack.c.bf16 %v160_v10, %v159_v9  ;;  %v98_v16 = vld [vmem:[#allocation7] sm:$0xff] }
  0x3f   :  { %1103 = vmatprep.subr.bf16.mxu0 %v1404_v0  ;;  %1111 = vmatprep.subr.bf16.mxu1 %v1404_v0  ;;  %v1480_v15 = vpack.c.bf16 %v101_v12, %v100_v11  ;;  %v99_v17 = vld [vmem:[#allocation7 + $0x8] sm:$0xff]  ;;  %v1028_v24 = vld [vmem:[%s1629_s4] ss:$0 sm:$0xff] }
  0x40   :  { %v1487_v18 = vpack.c.bf16 %v99_v17, %v98_v16 }
  0x42   :  { %1104 = vmatpush3.bf16.msra.mxu0 %v96_v7  ;;  %1112 = vmatpush3.bf16.msra.mxu1 %v96_v7 }
  0x43   :  { %1117 = vmatprep.subr.bf16.mxu0 %v1404_v0  ;;  %1125 = vmatprep.subr.bf16.mxu1 %v1404_v0 }
  0x45   :  { %1106 = vmatmul.mubr.msk.bf16.vlgmr.msra.gmra.mxu0 %vm114_vm1, %v107_v13  ;;  %1114 = vmatmul.mubr.msk.bf16.vlgmr.msra.gmra.mxu1 %vm114_vm1, %v161_v14 }
  0x46   :  { %1118 = vmatpush3.bf16.msra.mxu0 %v1480_v15  ;;  %1121 = vmatprep.mubr.msk.bf16.mxu0 %vm1405_vm0, %v1404_v0 }
  0x47   :  { %1119 = vmatprep.subr.bf16.mxu0 %v1404_v0  ;;  %1126 = vmatpush3.bf16.msra.mxu1 %v1480_v15 }
  0x48   :  { %1127 = vmatprep.subr.bf16.mxu1 %v1404_v0  ;;  %1129 = vmatprep.mubr.msk.bf16.mxu1 %vm1405_vm0, %v1404_v0 }
  0x4a   :  { %1120 = vmatpush3.bf16.msra.mxu0 %v1487_v18 }
  0x4b   :  { %1133 = vmatprep.subr.bf16.mxu0 %v1404_v0  ;;  %1128 = vmatpush3.bf16.msra.mxu1 %v1487_v18 }
  0x4c   :  { %1141 = vmatprep.subr.bf16.mxu1 %v1404_v0 }
  0x4d   :  { %1122 = vmatmul.mubr.bf16.vlgmr.msra.gmra.mxu0 %v1406_v19 }
  0x4e   :  { %1134 = vmatpush3.bf16.msra.mxu0 %v1480_v15  ;;  %1137 = vmatprep.mubr.msk.bf16.mxu0 %vm1405_vm0, %v1404_v0 }
  0x4f   :  { %1135 = vmatprep.subr.bf16.mxu0 %v1404_v0 }
  0x52   :  { %1136 = vmatpush3.bf16.msra.mxu0 %v1487_v18 }
  0x53   :  { %1149 = vmatprep.subr.bf16.mxu0 %v1404_v0 }
 0x105   :  { %v152_v20 = vpop.f32.mrf.mxu0  ;;  %v199_v21 = vpop.f32.mrf.mxu1 }
 0x106   :  { %v1511_v28 = vadd.f32 %v1028_v24, %v199_v21  ;;  %v1515_v32 = vadd.f32 %v1028_v24, %v152_v20 }
 0x107   :  { %v1107_v22 = vpop.f32.mrf.mxu0  ;;  %v1115_v23 = vpop.f32.mrf.mxu1 }
 0x109   :  { %v155_v25 = vpop.f32.mrf.mxu0  ;;  %v202_v26 = vpop.f32.mrf.mxu1 }
 0x10a   :  { %v1509_v27 = vadd.f32 %v1028_v24, %v155_v25  ;;  %v1513_v29 = vadd.f32 %v1028_v24, %v202_v26 }
 0x10b   :  { %v1108_v30 = vpop.f32.mrf.mxu0  ;;  %v1116_v31 = vpop.f32.mrf.mxu1 }
 0x10d   :  { %v243_v33 = vpop.f32.mrf.mxu0 }
 0x10e   :  { %v249_v34 = vadd.f32 %v243_v33, %v1515_v32  ;;  %v251_v35 = vadd.f32 %v243_v33, %v1511_v28 }
 0x10f   :  { %v1123_v36 = vpop.f32.mrf.mxu0 }
 0x110   :  { %1255 = vtanh.f32 %v249_v34 }
 0x111   :  { %1257 = vtanh.f32 %v251_v35  ;;  %v246_v37 = vpop.f32.mrf.mxu0 }
 0x113   :  { %v1124_v38 = vpop.f32.mrf.mxu0 }
 0x11d   :  { %v1256_v39 = vpop.eup %1255 }
 0x11e   :  { %v1258_v40 = vpop.eup %1257  ;;  %v253_v41 = vpack.c.bf16 %v1256_v39, %v1256_v39 }
 0x11f   :  { %v302_v42 = vpack.c.bf16 %v1258_v40, %v1258_v40 }
 0x120   :  { %1130 = vmatmul.mubr.msk.bf16.vlgmr.msra.gmra.mxu1 %vm114_vm1, %v253_v41 }
 0x121   :  { %1138 = vmatmul.mubr.msk.bf16.vlgmr.msra.gmra.mxu0 %vm114_vm1, %v302_v42  ;;  %1142 = vmatpush3.bf16.msra.mxu1 %v1480_v15 }
 0x122   :  { %1150 = vmatpush3.bf16.msra.mxu0 %v1480_v15  ;;  %1143 = vmatprep.subr.bf16.mxu1 %v1404_v0 }
 0x123   :  { %1151 = vmatprep.subr.bf16.mxu0 %v1404_v0  ;;  %1145 = vmatprep.mubr.msk.bf16.mxu1 %vm1405_vm0, %v1404_v0 }
 0x124   :  { %1153 = vmatprep.mubr.msk.bf16.mxu0 %vm1405_vm0, %v1404_v0 }
 0x125   :  { %1144 = vmatpush3.bf16.msra.mxu1 %v1487_v18 }
 0x126   :  { %1152 = vmatpush3.bf16.msra.mxu0 %v1487_v18  ;;  %1157 = vmatprep.subr.bf16.mxu1 %v1404_v0 }
 0x127   :  { %1165 = vmatprep.subr.bf16.mxu0 %v1404_v0 }
 0x1e0   :  { %v291_v43 = vpop.f32.mrf.mxu1 }
 0x1e1   :  { %v298_v44 = vrot.slane %v291_v43, 6  ;;  %v340_v45 = vpop.f32.mrf.mxu0 }
 0x1e2   :  { %v347_v46 = vrot.slane %v340_v45, 6  ;;  %v1131_v47 = vpop.f32.mrf.mxu1 }
 0x1e3   :  { %v300_v48 = vadd.f32 %v298_v44, %v1515_v32  ;;  %v1139_v49 = vpop.f32.mrf.mxu0 }
 0x1e4   :  { %v349_v50 = vadd.f32 %v347_v46, %v1511_v28  ;;  %v294_v51 = vpop.f32.mrf.mxu1 }
 0x1e5   :  { %1259 = vtanh.f32 %v300_v48  ;;  %v343_v52 = vpop.f32.mrf.mxu0 }
 0x1e6   :  { %1261 = vtanh.f32 %v349_v50  ;;  %v1132_v53 = vpop.f32.mrf.mxu1 }
 0x1e7   :  { %v1140_v54 = vpop.f32.mrf.mxu0 }
 0x1f2   :  { %v1260_v55 = vpop.eup %1259 }
 0x1f3   :  { %v1262_v56 = vpop.eup %1261  ;;  %v351_v57 = vpack.c.bf16 %v1260_v55, %v1260_v55 }
 0x1f4   :  { %v402_v58 = vpack.c.bf16 %v1262_v56, %v1262_v56 }
 0x1f5   :  { %v353_v59 = vrot.slane %v351_v57, 1 }
 0x1f6   :  { %v404_v60 = vrot.slane %v402_v58, 1 }
 0x1f7   :  { %1146 = vmatmul.mubr.msk.bf16.vlgmr.msra.gmra.mxu1 %vm114_vm1, %v353_v59 }
 0x1f8   :  { %1154 = vmatmul.mubr.msk.bf16.vlgmr.msra.gmra.mxu0 %vm114_vm1, %v404_v60  ;;  %1158 = vmatpush3.bf16.msra.mxu1 %v1480_v15 }
 0x1f9   :  { %1166 = vmatpush3.bf16.msra.mxu0 %v1480_v15  ;;  %1159 = vmatprep.subr.bf16.mxu1 %v1404_v0 }
 0x1fa   :  { %1167 = vmatprep.subr.bf16.mxu0 %v1404_v0  ;;  %1161 = vmatprep.mubr.msk.bf16.mxu1 %vm1405_vm0, %v1404_v0 }
 0x1fb   :  { %1169 = vmatprep.mubr.msk.bf16.mxu0 %vm1405_vm0, %v1404_v0 }
 0x1fc   :  { %1160 = vmatpush3.bf16.msra.mxu1 %v1487_v18 }
 0x1fd   :  { %1168 = vmatpush3.bf16.msra.mxu0 %v1487_v18  ;;  %1173 = vmatprep.subr.bf16.mxu1 %v1404_v0 }
 0x1fe   :  { %1181 = vmatprep.subr.bf16.mxu0 %v1404_v0 }
 0x2b7   :  { %v391_v61 = vpop.f32.mrf.mxu1 }
 0x2b8   :  { %v398_v62 = vrot.slane %v391_v61, 4  ;;  %v442_v63 = vpop.f32.mrf.mxu0 }
 0x2b9   :  { %v449_v1 = vrot.slane %v442_v63, 4  ;;  %v1147_v2 = vpop.f32.mrf.mxu1 }
 0x2ba   :  { %v400_v3 = vadd.f32 %v398_v62, %v1515_v32  ;;  %v1155_v4 = vpop.f32.mrf.mxu0 }
 0x2bb   :  { %v451_v5 = vadd.f32 %v449_v1, %v1511_v28  ;;  %v394_v6 = vpop.f32.mrf.mxu1 }
 0x2bc   :  { %1263 = vtanh.f32 %v400_v3  ;;  %v445_v7 = vpop.f32.mrf.mxu0 }
 0x2bd   :  { %1265 = vtanh.f32 %v451_v5  ;;  %v1148_v8 = vpop.f32.mrf.mxu1 }
 0x2be   :  { %v1156_v9 = vpop.f32.mrf.mxu0 }
 0x2c9   :  { %v1264_v10 = vpop.eup %1263 }
 0x2ca   :  { %v1266_v11 = vpop.eup %1265  ;;  %v453_v12 = vpack.c.bf16 %v1264_v10, %v1264_v10 }
 0x2cb   :  { %v504_v13 = vpack.c.bf16 %v1266_v11, %v1266_v11 }
 0x2cc   :  { %v455_v14 = vrot.slane %v453_v12, 2 }
 0x2cd   :  { %v506_v16 = vrot.slane %v504_v13, 2 }
 0x2ce   :  { %1162 = vmatmul.mubr.msk.bf16.vlgmr.msra.gmra.mxu1 %vm114_vm1, %v455_v14 }
 0x2cf   :  { %1170 = vmatmul.mubr.msk.bf16.vlgmr.msra.gmra.mxu0 %vm114_vm1, %v506_v16  ;;  %1174 = vmatpush3.bf16.msra.mxu1 %v1480_v15 }
 0x2d0   :  { %1182 = vmatpush3.bf16.msra.mxu0 %v1480_v15  ;;  %1175 = vmatprep.subr.bf16.mxu1 %v1404_v0 }
 0x2d1   :  { %1183 = vmatprep.subr.bf16.mxu0 %v1404_v0  ;;  %1177 = vmatprep.mubr.msk.bf16.mxu1 %vm1405_vm0, %v1404_v0 }
 0x2d2   :  { %1185 = vmatprep.mubr.msk.bf16.mxu0 %vm1405_vm0, %v1404_v0 }
 0x2d3   :  { %1176 = vmatpush3.bf16.msra.mxu1 %v1487_v18 }
 0x2d4   :  { %1184 = vmatpush3.bf16.msra.mxu0 %v1487_v18  ;;  %1189 = vmatprep.subr.bf16.mxu1 %v1404_v0 }
 0x2d5   :  { %1197 = vmatprep.subr.bf16.mxu0 %v1404_v0 }
 0x38e   :  { %v493_v17 = vpop.f32.mrf.mxu1 }
 0x38f   :  { %v500_v19 = vrot.slane %v493_v17, 2  ;;  %v544_v20 = vpop.f32.mrf.mxu0 }
 0x390   :  { %v551_v21 = vrot.slane %v544_v20, 2  ;;  %v1163_v22 = vpop.f32.mrf.mxu1 }
 0x391   :  { %v502_v23 = vadd.f32 %v500_v19, %v1515_v32  ;;  %v1171_v24 = vpop.f32.mrf.mxu0 }
 0x392   :  { %v553_v25 = vadd.f32 %v551_v21, %v1511_v28  ;;  %v496_v26 = vpop.f32.mrf.mxu1 }
 0x393   :  { %1267 = vtanh.f32 %v502_v23  ;;  %v547_v30 = vpop.f32.mrf.mxu0  ;;  %v957_v26 = vld [vmem:[#allocation9 + $0x18] sm:$0xff] }
 0x394   :  { %1269 = vtanh.f32 %v553_v25  ;;  %v1164_v31 = vpop.f32.mrf.mxu1  ;;  %v956_v25 = vld [vmem:[#allocation9 + $0x10] sm:$0xff] }
 0x395   :  { %v1172_v33 = vpop.f32.mrf.mxu0  ;;  %v959_v30 = vpack.c.bf16 %v957_v26, %v956_v25  ;;  %v954_v31 = vld [vmem:[#allocation9] sm:$0xff] }
 0x396   :  { %v955_v33 = vld [vmem:[#allocation9 + $0x8] sm:$0xff] }
 0x3a0   :  { %v1268_v34 = vpop.eup %1267 }
 0x3a1   :  { %v1270_v35 = vpop.eup %1269  ;;  %v555_v36 = vpack.c.bf16 %v1268_v34, %v1268_v34  ;;  %v958_v34 = vpack.c.bf16 %v955_v33, %v954_v31 }
 0x3a2   :  { %v603_v37 = vpack.c.bf16 %v1270_v35, %v1270_v35 }
 0x3a3   :  { %v557_v38 = vrot.slane %v555_v36, 3 }
 0x3a4   :  { %v605_v39 = vrot.slane %v603_v37, 3 }
 0x3a5   :  { %1178 = vmatmul.mubr.msk.bf16.vlgmr.msra.gmra.mxu1 %vm114_vm1, %v557_v38 }
 0x3a6   :  { %1186 = vmatmul.mubr.msk.bf16.vlgmr.msra.gmra.mxu0 %vm114_vm1, %v605_v39  ;;  %1190 = vmatpush3.bf16.msra.mxu1 %v1480_v15 }
 0x3a7   :  { %1198 = vmatpush3.bf16.msra.mxu0 %v1480_v15  ;;  %1191 = vmatprep.subr.bf16.mxu1 %v1404_v0 }
 0x3a8   :  { %1199 = vmatprep.subr.bf16.mxu0 %v1404_v0  ;;  %1193 = vmatprep.mubr.msk.bf16.mxu1 %vm1405_vm0, %v1404_v0 }
 0x3a9   :  { %1201 = vmatprep.mubr.msk.bf16.mxu0 %vm1405_vm0, %v1404_v0 }
 0x3aa   :  { %1192 = vmatpush3.bf16.msra.mxu1 %v1487_v18 }
 0x3ab   :  { %1200 = vmatpush3.bf16.msra.mxu0 %v1487_v18  ;;  %1205 = vmatprep.subr.bf16.mxu1 %v1404_v0 }
 0x3ac   :  { %1213 = vmatprep.subr.bf16.mxu0 %v1404_v0 }
 0x465   :  { %v595_v28 = vpop.f32.mrf.mxu1 }
 0x466   :  { %v601_v32 = vadd.f32 %v595_v28, %v1509_v27  ;;  %v643_v40 = vpop.f32.mrf.mxu0 }
 0x467   :  { %v649_v41 = vadd.f32 %v643_v40, %v1513_v29  ;;  %v1179_v42 = vpop.f32.mrf.mxu1 }
 0x468   :  { %1271 = vtanh.f32 %v601_v32  ;;  %v1187_v43 = vpop.f32.mrf.mxu0 }
 0x469   :  { %1273 = vtanh.f32 %v649_v41  ;;  %v598_v44 = vpop.f32.mrf.mxu1 }
 0x46a   :  { %v646_v45 = vpop.f32.mrf.mxu0 }
 0x46b   :  { %v1180_v46 = vpop.f32.mrf.mxu1 }
 0x46c   :  { %v1188_v47 = vpop.f32.mrf.mxu0 }
 0x475   :  { %v1272_v48 = vpop.eup %1271 }
 0x476   :  { %v1274_v49 = vpop.eup %1273  ;;  %v651_v50 = vpack.c.bf16 %v1272_v48, %v1272_v48 }
 0x477   :  { %v700_v51 = vpack.c.bf16 %v1274_v49, %v1274_v49 }
 0x478   :  { %1194 = vmatmul.mubr.msk.bf16.vlgmr.msra.gmra.mxu1 %vm114_vm1, %v651_v50 }
 0x479   :  { %1202 = vmatmul.mubr.msk.bf16.vlgmr.msra.gmra.mxu0 %vm114_vm1, %v700_v51  ;;  %1206 = vmatpush3.bf16.msra.mxu1 %v1480_v15 }
 0x47a   :  { %1214 = vmatpush3.bf16.msra.mxu0 %v1480_v15  ;;  %1207 = vmatprep.subr.bf16.mxu1 %v1404_v0 }
 0x47b   :  { %1215 = vmatprep.subr.bf16.mxu0 %v1404_v0  ;;  %1209 = vmatprep.mubr.msk.bf16.mxu1 %vm1405_vm0, %v1404_v0 }
 0x47c   :  { %1217 = vmatprep.mubr.msk.bf16.mxu0 %vm1405_vm0, %v1404_v0 }
 0x47d   :  { %1208 = vmatpush3.bf16.msra.mxu1 %v1487_v18 }
 0x47e   :  { %1216 = vmatpush3.bf16.msra.mxu0 %v1487_v18  ;;  %1221 = vmatprep.subr.bf16.mxu1 %v1404_v0 }
 0x47f   :  { %1229 = vmatprep.subr.bf16.mxu0 %v1404_v0 }
 0x538   :  { %v689_v52 = vpop.f32.mrf.mxu1 }
 0x539   :  { %v696_v53 = vrot.slane %v689_v52, 6  ;;  %v738_v54 = vpop.f32.mrf.mxu0 }
 0x53a   :  { %v745_v55 = vrot.slane %v738_v54, 6  ;;  %v1195_v56 = vpop.f32.mrf.mxu1 }
 0x53b   :  { %v698_v57 = vadd.f32 %v696_v53, %v1509_v27  ;;  %v1203_v58 = vpop.f32.mrf.mxu0 }
 0x53c   :  { %v747_v59 = vadd.f32 %v745_v55, %v1513_v29  ;;  %v692_v60 = vpop.f32.mrf.mxu1 }
 0x53d   :  { %1275 = vtanh.f32 %v698_v57  ;;  %v741_v61 = vpop.f32.mrf.mxu0 }
 0x53e   :  { %1277 = vtanh.f32 %v747_v59  ;;  %v1196_v62 = vpop.f32.mrf.mxu1 }
 0x53f   :  { %v1204_v63 = vpop.f32.mrf.mxu0 }
 0x54a   :  { %v1276_v1 = vpop.eup %1275 }
 0x54b   :  { %v1278_v2 = vpop.eup %1277  ;;  %v749_v3 = vpack.c.bf16 %v1276_v1, %v1276_v1 }
 0x54c   :  { %v800_v4 = vpack.c.bf16 %v1278_v2, %v1278_v2 }
 0x54d   :  { %v751_v5 = vrot.slane %v749_v3, 1 }
 0x54e   :  { %v802_v6 = vrot.slane %v800_v4, 1 }
 0x54f   :  { %1210 = vmatmul.mubr.msk.bf16.vlgmr.msra.gmra.mxu1 %vm114_vm1, %v751_v5 }
 0x550   :  { %1218 = vmatmul.mubr.msk.bf16.vlgmr.msra.gmra.mxu0 %vm114_vm1, %v802_v6  ;;  %1222 = vmatpush3.bf16.msra.mxu1 %v1480_v15 }
 0x551   :  { %1230 = vmatpush3.bf16.msra.mxu0 %v1480_v15  ;;  %1223 = vmatprep.subr.bf16.mxu1 %v1404_v0 }
 0x552   :  { %1231 = vmatprep.subr.bf16.mxu0 %v1404_v0  ;;  %1225 = vmatprep.mubr.msk.bf16.mxu1 %vm1405_vm0, %v1404_v0 }
 0x553   :  { %1233 = vmatprep.mubr.msk.bf16.mxu0 %vm1405_vm0, %v1404_v0 }
 0x554   :  { %1224 = vmatpush3.bf16.msra.mxu1 %v1487_v18 }
 0x555   :  { %1232 = vmatpush3.bf16.msra.mxu0 %v1487_v18  ;;  %1237 = vmatprep.subr.bf16.mxu1 %v1404_v0 }
 0x60f   :  { %v789_v7 = vpop.f32.mrf.mxu1 }
 0x610   :  { %v796_v8 = vrot.slane %v789_v7, 4  ;;  %v840_v9 = vpop.f32.mrf.mxu0 }
 0x611   :  { %v847_v15 = vrot.slane %v840_v9, 4  ;;  %v1211_v10 = vpop.f32.mrf.mxu1 }
 0x612   :  { %v798_v11 = vadd.f32 %v796_v8, %v1509_v27  ;;  %v1219_v12 = vpop.f32.mrf.mxu0 }
 0x613   :  { %v849_v13 = vadd.f32 %v847_v15, %v1513_v29  ;;  %v792_v14 = vpop.f32.mrf.mxu1 }
 0x614   :  { %1279 = vtanh.f32 %v798_v11  ;;  %v843_v16 = vpop.f32.mrf.mxu0 }
 0x615   :  { %1281 = vtanh.f32 %v849_v13  ;;  %v1212_v17 = vpop.f32.mrf.mxu1 }
 0x616   :  { %v1220_v19 = vpop.f32.mrf.mxu0 }
 0x621   :  { %v1280_v20 = vpop.eup %1279 }
 0x622   :  { %v1282_v18 = vpop.eup %1281  ;;  %v851_v21 = vpack.c.bf16 %v1280_v20, %v1280_v20 }
 0x623   :  { %v902_v22 = vpack.c.bf16 %v1282_v18, %v1282_v18 }
 0x624   :  { %v853_v23 = vrot.slane %v851_v21, 2 }
 0x625   :  { %v904_v24 = vrot.slane %v902_v22, 2 }
 0x626   :  { %1226 = vmatmul.mubr.msk.bf16.vlgmr.msra.gmra.mxu1 %vm114_vm1, %v853_v23 }
 0x627   :  { %1234 = vmatmul.mubr.msk.bf16.vlgmr.msra.gmra.mxu0 %vm114_vm1, %v904_v24  ;;  %1241 = vmatprep.mubr.msk.bf16.mxu1 %vm1405_vm0, %v1404_v0 }
 0x628   :  { %1238 = vmatpush3.bf16.msra.mxu1 %v959_v30 }
 0x629   :  { %1239 = vmatprep.subr.bf16.mxu1 %v1404_v0 }
 0x62c   :  { %1240 = vmatpush3.bf16.msra.mxu1 %v958_v34 }
 0x6e6   :  { %v891_v35 = vpop.f32.mrf.mxu1 }
 0x6e7   :  { %v898_v36 = vrot.slane %v891_v35, 2  ;;  %v942_v37 = vpop.f32.mrf.mxu0 }
 0x6e8   :  { %v1227_v38 = vpop.f32.mrf.mxu1  ;;  %v949_v0 = vrot.slane %v942_v37, 2 }
 0x6e9   :  { %v900_v39 = vadd.f32 %v898_v36, %v1509_v27  ;;  %v1235_v28 = vpop.f32.mrf.mxu0 }
 0x6ea   :  { %v894_v32 = vpop.f32.mrf.mxu1  ;;  %v951_v46 = vadd.f32 %v949_v0, %v1513_v29 }
 0x6eb   :  { %1283 = vtanh.f32 %v900_v39  ;;  %v945_v40 = vpop.f32.mrf.mxu0 }
 0x6ec   :  { %v1228_v41 = vpop.f32.mrf.mxu1  ;;  %1285 = vtanh.f32 %v951_v46 }
 0x6ed   :  { %v1236_v42 = vpop.f32.mrf.mxu0 }
 0x6f8   :  { %v1284_v43 = vpop.eup %1283 }
 0x6f9   :  { %v953_v44 = vpack.c.bf16 %v1284_v43, %v1284_v43  ;;  %v1286_v47 = vpop.eup %1285 }
 0x6fa   :  { %v1006_v48 = vrot.slane %v1286_v47, 6 }
 0x6fb   :  { %v961_v45 = vrot.slane %v953_v44, 3 }
 0x6fd   :  { %1242 = vmatmul.mubr.msk.bf16.vlgmr.msra.gmra.mxu1 %vm114_vm1, %v961_v45 }
 0x7bd   :  { %v999_v49 = vpop.f32.mrf.mxu1 }
 0x7be   :  { %v1008_v27 = vmul.f32 %v1006_v48, %v999_v49 }
 0x7bf   :  { %v1243_v50 = vpop.f32.mrf.mxu1 }
 0x7c0   :  { %v1010_v51 = vsel %vm1009_vm2, %v1008_v27, 0.0 }
 0x7c1   :  { %v1002_v52 = vpop.f32.mrf.mxu1  ;;  %1011 = vadd.xlane.f32.xlu0 %v1010_v51 }
 0x7c3   :  { %v1244_v53 = vpop.f32.mrf.mxu1 }
 0x84a   :  { %v1012_v54 = vpop.xlane.xlu0 %1011 }
 0x84b   :  { %v1046_v55 = vmul.f32 -1.442695, %v1012_v54 }
 0x84d   :  { %1287 = vpow2.f32 %v1046_v55 }
 0x85a   :  { %v1288_v56 = vpop.eup %1287 }
 0x85b   :  { %v1016_v57 = vadd.f32 1.0, %v1288_v56 }
 0x85d   :  { %1289 = vrcp.f32 %v1016_v57 }
 0x86a   :  { %v1290_v58 = vpop.eup %1289 }
 0x86b   :  { %1020 = vst.msk [vmem:[%s1631_s6] sm:$0x3] %vm1019_vm3, %v1290_v58 }
 0x86c   :  { %1025 = vsyncpa [#allocation3], 1 }
 0x86d   :  { %1026 = vsyncpa [#allocation5], 1 }
 0x86e   :  { %1027 = vsyncpa [#allocation8], 1 }

</bundles_post_ra>
